<compile_context>
chip_gen: v7x
topology: tpu7x:2x2x1
jax: 0.10.0
libtpu: 0.0.40
codegen_flags: <defaults>
</compile_context>

<pallas_src>
import jax
import jax.numpy as jnp
from jax import lax
from jax.experimental import pallas as pl
from jax.experimental.pallas import tpu as pltpu

_LANE = 128


# ----------------------------------------------------------------------------
# Reconstruction kernel: TG sub-graphs per grid step.
#   gram  = h @ h.T   (packed, one bf16 MXU pass, f32 accumulate)
#   x     = 1 - 2*sigmoid(gram) = -tanh(gram/2)
#   CE    = softplus(x)        for target==1
#         = softplus(x) - x    for target==0     (softplus(-x))
# Output per step: (2, LANE) lane-dense row of per-column pos / neg CE sums
# over the block-diagonal slab; the weighted-mean finish happens in the wrapper.
# ----------------------------------------------------------------------------
def _construct_kernel(h_ref, tgt_ref, out_ref):
    P, D = h_ref.shape                     # P = TG * N rows of packed node feats
    _, N, LANE = tgt_ref.shape
    TG = P // N

    # One packed MXU pass; contracting on D of both operands so the rhs
    # transpose happens inside the MXU (no materialized XLU transpose).
    gram = lax.dot_general(
        h_ref[...], h_ref[...],
        dimension_numbers=(((1,), (1,)), ((), ())),
        preferred_element_type=jnp.float32)                 # (P, P) f32

    # Only the TG diagonal NxN blocks matter: gather them into one lane-dense
    # (N, P) slab so the transcendental / mask / reduce work is 1/TG of a
    # full-tile epilogue.
    blocks = [gram[g * N:(g + 1) * N, g * N:(g + 1) * N] for g in range(TG)]
    diag = jnp.concatenate(blocks, axis=1)                  # (N, P) == (16, 128)

    # 1 - 2*sigmoid(g) == -tanh(g/2): single EUP op, no extra live value.
    x = -jnp.tanh(0.5 * diag)                               # in [-1, 1] -> stable
    sp = jnp.log(1.0 + jnp.exp(x))                          # softplus(x)

    tgt = tgt_ref[0]                                        # (N, LANE) 0/1 targets
    is_pos = tgt[:, :P] > 0.5                               # target = adj + I
    zero = jnp.zeros_like(sp)
    pos_terms = jnp.where(is_pos, sp, zero)                 # CE | target == 1
    neg_terms = jnp.where(is_pos, zero, sp - x)             # softplus(-x) = sp - x

    col_pos = jnp.sum(pos_terms, axis=0, keepdims=True)     # (1, P) sublane folds
    col_neg = jnp.sum(neg_terms, axis=0, keepdims=True)
    row = jnp.concatenate([col_pos, col_neg], axis=0)       # (2, P)
    if P < LANE:                                            # keep the store lane-dense
        row = jnp.concatenate(
            [row, jnp.zeros((2, LANE - P), jnp.float32)], axis=1)
    out_ref[...] = row.reshape(1, 2, LANE)


def construct_losses(h_flat, adj_flat):
    """Per-sub-graph weighted reconstruction CE. h_flat: (GM,N,D), adj_flat: (GM,N,N)."""
    GM, N, D = h_flat.shape
    # Positive count per sub-graph, hoisted out of the kernel (XLA fuses it).
    s = adj_flat.astype(jnp.float32).sum(axis=(-1, -2)) + jnp.float32(N)   # (GM,)

    TG = max(1, min(GM, _LANE // N))                        # sub-graphs per step
    P = TG * N
    num_blocks = pl.cdiv(GM, TG)
    if num_blocks > 1 and num_blocks % 2 == 1:
        num_blocks += 1                                     # even split on v7x's 2 TCs
    padded = num_blocks * TG

    if padded != GM:                                        # pad with dummy sub-graphs
        h_flat = jnp.concatenate(
            [h_flat, jnp.zeros((padded - GM, N, D), h_flat.dtype)], axis=0)
        adj_flat = jnp.concatenate(
            [adj_flat, jnp.zeros((padded - GM, N, N), adj_flat.dtype)], axis=0)

    # bf16 MXU feed: halves the h DMA and guarantees a single-pass vmatmul.
    h2 = h_flat.reshape(num_blocks * P, D).astype(jnp.bfloat16)

    # Target slab: (adj + I) of the TG sub-graphs of each block laid side by
    # side along lanes -> tgt_slab[b, n, g*N + m] = adj[b*TG+g, n, m] + I[n, m].
    tgt = adj_flat.astype(jnp.float32).reshape(num_blocks, TG, N, N) \
        + jnp.eye(N, dtype=jnp.float32)
    tgt_slab = jnp.transpose(tgt, (0, 2, 1, 3)).reshape(num_blocks, N, P)
    if P < _LANE:
        tgt_slab = jnp.pad(tgt_slab, ((0, 0), (0, 0), (0, _LANE - P)))

    out = pl.pallas_call(
        _construct_kernel,
        out_shape=jax.ShapeDtypeStruct((num_blocks, 2, _LANE), jnp.float32),
        grid_spec=pltpu.PrefetchScalarGridSpec(
            num_scalar_prefetch=0,
            grid=(num_blocks,),
            in_specs=[
                pl.BlockSpec((P, D), lambda i: (i, 0)),
                pl.BlockSpec((1, N, _LANE), lambda i: (i, 0, 0)),
            ],
            out_specs=pl.BlockSpec((1, 2, _LANE), lambda i: (i, 0, 0)),
        ),
        compiler_params=pltpu.CompilerParams(
            dimension_semantics=("parallel",)),
    )(h2, tgt_slab)

    # Wrapper finish (tiny, XLA-fused): fold lane groups of N into per-sub-graph
    # sums, then apply PyTorch's weighted-mean normalization with pos_weight.
    sums = out[:, :, :P].reshape(num_blocks, 2, TG, N).sum(axis=-1)   # (nb, 2, TG)
    sum_pos = sums[:, 0, :].reshape(padded)[:GM]
    sum_neg = sums[:, 1, :].reshape(padded)[:GM]

    total = jnp.float32(N * N)
    pos_w = (total - s) / s
    num = pos_w * sum_pos + sum_neg
    den = pos_w * s + (total - s)
    return num / den                                        # (GM,) per-sub-graph CE


# ----------------------------------------------------------------------------
# Classification CE: tiny (B, C) problem -> plain JAX (cheaper than a custom call).
# ----------------------------------------------------------------------------
def _classify_cross_entropy(y_pred, y_true):
    logits = y_pred.astype(jnp.float32)
    m = jnp.max(logits, axis=-1, keepdims=True)
    lse = m[:, 0] + jnp.log(jnp.sum(jnp.exp(logits - m), axis=-1))
    true_logit = jnp.take_along_axis(
        logits, y_true.astype(jnp.int32)[:, None], axis=-1)[:, 0]
    return jnp.mean(lse - true_logit)


def _customized_loss_impl(y_pred, y_true, h, adj, alpha):
    G, M, N, D = h.shape
    classify_loss = _classify_cross_entropy(y_pred, y_true)
    per_sub = construct_losses(h.reshape(G * M, N, D),
                               adj.reshape(G * M, N, N)).reshape(G, M)
    # ConstructLoss: mean over the sub-graphs of each batched graph;
    # CustomizedLoss: sum over the list of batched graphs.
    construct_loss = jnp.sum(jnp.mean(per_sub, axis=1))
    loss = classify_loss + alpha * construct_loss
    return loss, classify_loss, construct_loss


customized_loss = jax.jit(_customized_loss_impl)


# ----------------------------------------------------------------------------
# Pure-JAX reference (naive per-sub-graph loop, strict f32 matmul).
# ----------------------------------------------------------------------------
def _reference(y_pred, y_true, h, adj, alpha):
    cls = _classify_cross_entropy(y_pred, y_true)
    G, M, N, _ = h.shape
    cons = jnp.float32(0.0)
    for g in range(G):
        sub = jnp.float32(0.0)
        for m in range(M):
            hh = h[g, m].astype(jnp.float32)
            z = jax.nn.sigmoid(jnp.matmul(hh, hh.T, precision=lax.Precision.HIGHEST))
            target = adj[g, m].astype(jnp.float32) + jnp.eye(N, dtype=jnp.float32)
            pred = jnp.stack([1.0 - z, z], axis=-1).reshape(-1, 2)
            t = target.reshape(-1).astype(jnp.int32)
            s = jnp.sum(target)
            pw = (N * N - s) / s
            w = jnp.where(t == 1, pw, 1.0)
            logp = jax.nn.log_softmax(pred, axis=-1)
            nll = -jnp.take_along_axis(logp, t[:, None], axis=-1)[:, 0]
            sub = sub + jnp.sum(w * nll) / jnp.sum(w)
        cons = cons + sub / M
    return cls + alpha * cons, cls, cons


if __name__ == "__main__":
    key = jax.random.PRNGKey(0)
    kp, kt, kh, ka = jax.random.split(key, 4)

    B, C = 8, 4                  # classification batch / classes
    G, M, N, D = 4, 4, 16, 32    # GM = 16 sub-graphs -> 2 packed grid steps of 8

    y_pred = jax.random.normal(kp, (B, C), dtype=jnp.float32)
    y_true = jax.random.randint(kt, (B,), 0, C, dtype=jnp.int32)
    h = 0.1 * jax.random.normal(kh, (G, M, N, D), dtype=jnp.float32)

    # deterministic symmetric 0/1 adjacency with zero diagonal
    u = jax.random.uniform(ka, (G, M, N, N))
    upper = (u > 0.6).astype(jnp.float32)
    adj = jnp.triu(upper, k=1)
    adj = adj + jnp.swapaxes(adj, -1, -2)

    loss, classify_loss, construct_loss = customized_loss(
        y_pred, y_true, h, adj, jnp.float32(0.5))
    jax.block_until_ready((loss, classify_loss, construct_loss))

    ref_loss, ref_cls, ref_cons = _reference(y_pred, y_true, h, adj, 0.5)
    assert jnp.allclose(classify_loss, ref_cls, rtol=1e-4, atol=1e-5)
    # bf16 MXU feed in the kernel vs strict-f32 reference -> slightly looser.
    assert jnp.allclose(construct_loss, ref_cons, rtol=2e-3, atol=2e-3), (
        construct_loss, ref_cons)
    assert jnp.allclose(loss, ref_loss, rtol=2e-3, atol=2e-3), (loss, ref_loss)

    print("KERNEL_OK")
</pallas_src>

<mosaic_0001>
module attributes {stable_mosaic.version = 11 : i64} {
  func.func @_construct_kernel(%arg0: i32, %arg1: memref<128x32xbf16, #tpu.memory_space<vmem>>, %arg2: memref<1x16x128xf32, #tpu.memory_space<vmem>>, %arg3: memref<1x2x128xf32, #tpu.memory_space<vmem>>) attributes {dimension_semantics = [#tpu.dimension_semantics<parallel>], iteration_bounds = array<i64: 2>, scalar_prefetch = 0 : i64, scratch_operands = 0 : i64, tpu.core_type = #tpu.core_type<tc>, window_params = [{transform_indices = @transform_0, window_bounds = array<i64: 128, 32>}, {transform_indices = @transform_1, window_bounds = array<i64: 1, 16, 128>}, {transform_indices = @transform_2, window_bounds = array<i64: 1, 2, 128>}]} {
    %c0 = arith.constant 0 : index
    %c0_0 = arith.constant 0 : index
    %0 = vector.load %arg1[%c0, %c0_0] : memref<128x32xbf16, #tpu.memory_space<vmem>>, vector<128x32xbf16>
    %c0_1 = arith.constant 0 : index
    %c0_2 = arith.constant 0 : index
    %1 = vector.load %arg1[%c0_1, %c0_2] : memref<128x32xbf16, #tpu.memory_space<vmem>>, vector<128x32xbf16>
    %cst = arith.constant dense<0.000000e+00> : vector<128x128xf32>
    %2 = tpu.matmul %0, %1, %cst {dimension_numbers = #tpu.dot_dimension_numbers<[1], [1], [0], [0], [0, 0, 1, 0], [], []>} : vector<128x32xbf16>, vector<128x32xbf16>, vector<128x128xf32> -> vector<128x128xf32>
    %3 = vector.extract_strided_slice %2 {offsets = [0, 0], sizes = [16, 16], strides = [1, 1]} : vector<128x128xf32> to vector<16x16xf32>
    %4 = vector.extract_strided_slice %2 {offsets = [16, 16], sizes = [16, 16], strides = [1, 1]} : vector<128x128xf32> to vector<16x16xf32>
    %5 = vector.extract_strided_slice %2 {offsets = [32, 32], sizes = [16, 16], strides = [1, 1]} : vector<128x128xf32> to vector<16x16xf32>
    %6 = vector.extract_strided_slice %2 {offsets = [48, 48], sizes = [16, 16], strides = [1, 1]} : vector<128x128xf32> to vector<16x16xf32>
    %7 = vector.extract_strided_slice %2 {offsets = [64, 64], sizes = [16, 16], strides = [1, 1]} : vector<128x128xf32> to vector<16x16xf32>
    %8 = vector.extract_strided_slice %2 {offsets = [80, 80], sizes = [16, 16], strides = [1, 1]} : vector<128x128xf32> to vector<16x16xf32>
    %9 = vector.extract_strided_slice %2 {offsets = [96, 96], sizes = [16, 16], strides = [1, 1]} : vector<128x128xf32> to vector<16x16xf32>
    %10 = vector.extract_strided_slice %2 {offsets = [112, 112], sizes = [16, 16], strides = [1, 1]} : vector<128x128xf32> to vector<16x16xf32>
    %11 = tpu.concatenate %3, %4, %5, %6, %7, %8, %9, %10 in 1 : vector<16x16xf32>, vector<16x16xf32>, vector<16x16xf32>, vector<16x16xf32>, vector<16x16xf32>, vector<16x16xf32>, vector<16x16xf32>, vector<16x16xf32> -> vector<16x128xf32>
    %cst_3 = arith.constant 5.000000e-01 : f32
    %12 = vector.broadcast %cst_3 : f32 to vector<16x128xf32>
    %13 = arith.mulf %12, %11 : vector<16x128xf32>
    %14 = math.tanh %13 : vector<16x128xf32>
    %cst_4 = arith.constant 0.000000e+00 : f32
    %15 = vector.broadcast %cst_4 : f32 to vector<16x128xf32>
    %16 = arith.subf %15, %14 : vector<16x128xf32>
    %17 = math.exp %16 : vector<16x128xf32>
    %cst_5 = arith.constant 1.000000e+00 : f32
    %18 = vector.broadcast %cst_5 : f32 to vector<16x128xf32>
    %19 = arith.addf %18, %17 : vector<16x128xf32>
    %20 = math.log %19 : vector<16x128xf32>
    %c0_6 = arith.constant 0 : index
    %c0_7 = arith.constant 0 : index
    %c0_8 = arith.constant 0 : index
    %21 = vector.load %arg2[%c0_6, %c0_7, %c0_8] : memref<1x16x128xf32, #tpu.memory_space<vmem>>, vector<1x16x128xf32>
    %22 = vector.shape_cast %21 : vector<1x16x128xf32> to vector<16x128xf32>
    %cst_9 = arith.constant 5.000000e-01 : f32
    %23 = vector.broadcast %cst_9 : f32 to vector<16x128xf32>
    %24 = arith.cmpf ogt, %22, %23 : vector<16x128xf32>
    %cst_10 = arith.constant 0.000000e+00 : f32
    %25 = vector.broadcast %cst_10 : f32 to vector<16x128xf32>
    %26 = arith.select %24, %20, %25 : vector<16x128xi1>, vector<16x128xf32>
    %27 = arith.subf %20, %16 : vector<16x128xf32>
    %28 = arith.select %24, %25, %27 : vector<16x128xi1>, vector<16x128xf32>
    %cst_11 = arith.constant dense<0.000000e+00> : vector<128xf32>
    %29 = vector.multi_reduction <add>, %26, %cst_11 [0] : vector<16x128xf32> to vector<128xf32>
    %30 = vector.shape_cast %29 : vector<128xf32> to vector<1x128xf32>
    %cst_12 = arith.constant dense<0.000000e+00> : vector<128xf32>
    %31 = vector.multi_reduction <add>, %28, %cst_12 [0] : vector<16x128xf32> to vector<128xf32>
    %32 = vector.shape_cast %31 : vector<128xf32> to vector<1x128xf32>
    %33 = tpu.concatenate %30, %32 in 0 : vector<1x128xf32>, vector<1x128xf32> -> vector<2x128xf32>
    %34 = vector.shape_cast %33 : vector<2x128xf32> to vector<1x2x128xf32>
    %c0_13 = arith.constant 0 : index
    %c0_14 = arith.constant 0 : index
    %c0_15 = arith.constant 0 : index
    %35 = vector.load %arg3[%c0_13, %c0_14, %c0_15] : memref<1x2x128xf32, #tpu.memory_space<vmem>>, vector<1x2x128xf32>
    tpu.vector_store %arg3[%c0_13, %c0_14, %c0_15], %34 {strides = array<i32>} : memref<1x2x128xf32, #tpu.memory_space<vmem>>, vector<1x2x128xf32>,
    return
  }
  func.func @transform_0(%arg0: i32) -> (i32, i32) {
    %c0_i32 = arith.constant 0 : i32
    %c0_i32_0 = arith.constant 0 : i32
    return %arg0, %c0_i32 : i32, i32
  }
  func.func @transform_1(%arg0: i32) -> (i32, i32, i32) {
    %c0_i32 = arith.constant 0 : i32
    %c0_i32_0 = arith.constant 0 : i32
    %c0_i32_1 = arith.constant 0 : i32
    return %arg0, %c0_i32, %c0_i32_0 : i32, i32, i32
  }
  func.func @transform_2(%arg0: i32) -> (i32, i32, i32) {
    %c0_i32 = arith.constant 0 : i32
    %c0_i32_0 = arith.constant 0 : i32
    %c0_i32_1 = arith.constant 0 : i32
    return %arg0, %c0_i32, %c0_i32_0 : i32, i32, i32
  }
}

</mosaic_0001>

<bundles_post_ra>
// kernel: _customized_loss_impl.1
= control target key start
LH: loop header
LB: loop body
LE: loop exit
PB: predicated region body
PF: predicated region fallthrough
CT: control target
= control target key end

     0   :  { %s631_s9 = smov 0   ;;  %s706_s0 = inlined_call_operand.vmem [shape: bf16[256,32], index: 0, kind: input, shape index: {}]   ;;  %s707_s1 = inlined_call_operand.vmem [shape: f32[2,16,128], index: 1, kind: input, shape index: {}]   ;;  %s708_s2 = inlined_call_operand.vmem [shape: f32[2,2,128], index: 2, kind: output, shape index: {}]  }
   0x1 LB: > { %s637_s10 = sadd.s32 4294967295, %s614_s9   ;;  %p475_p0 = scmp.ge.s32.totalorder %s614_s9, 1  ;;  %s614_s9 = sphi %s631_s9, %s12_s9  }
   0x2   : > { %p123_p1 = scmp.lt.s32.totalorder %s614_s9, 3 }
   0x4   : > { %p124_p2 = pnand %p475_p0, %p123_p1 }
   0x5   : > { %s476_s11 = sshll.u32 (!%p124_p2), %s637_s10, 4  ;;  %vm221_vm0 = vcmask (!%p124_p2), 261120   ;;  %vm343_vm1 = vcmask (!%p124_p2), 130048   ;;  %vm348_vm2 = vcmask (!%p124_p2), 392192   ;;  %vm351_vm3 = vcmask (!%p124_p2), 523264   ;;  %p155_p4 = scmp.lt.s32.totalorder (!%p124_p2), %s637_s10, 1 }
   0x6   : > { %127 = sbr.rel (%p124_p2) target bundleno = 372 (0x174), region = 28  ;;  %p150_p3 = scmp.lt.s32.totalorder (!%p124_p2), %s476_s11, 31  ;;  %vm354_vm4 = vcmask (!%p124_p2), 654336   ;;  %vm357_vm5 = vcmask (!%p124_p2), 785408   ;;  %vm360_vm6 = vcmask (!%p124_p2), 916480   ;;  %vm403_vm9 = vcmask (!%p124_p2), 1040384  }
   0xd   : > { %s710_s11 = smov (!%p150_p3, %s476_s11), 31  ;;  %s712_s10 = smov (!%p155_p4, %s637_s10), 1 }
   0xe   : > { %s477_s12 = sshll.u32 %s710_s11, 2  ;;  %s499_s16 = sshll.u32 %s712_s10, 4 }
   0xf   : > { %s645_s15 = scalar_lea.vmem %s706_s0, %s477_s12  ;;  %s159_s19 = scalar_lea.vmem %s707_s1, %s499_s16 }
  0x10   : > { %v588_v0 = vld [vmem:[%s645_s15] sm:$0xff]   ;;  %v589_v1 = vld [vmem:[%s645_s15 + $0x8] sm:$0xff]   ;;  %v590_v5 = vld [vmem:[%s645_s15 + $0x10] sm:$0xff]   ;;  %s480_s20 = sshll.u32 %s712_s10, 1 }
  0x11   : > { %564 = vmatprep.subr.msk.bf16.mxu0 %vm221_vm0, %v588_v0  ;;  %565 = vmatprep.subr.msk.bf16.mxu1 %vm221_vm0, %v588_v0  ;;  %v223_v2 = vsel %vm221_vm0, %v588_v0, 0  ;;  %v592_v3 = vld [vmem:[%s645_s15 + $0x20] sm:$0xff]   ;;  %v226_v4 = vsel %vm221_vm0, %v589_v1, 0  ;;  %v229_v6 = vsel %vm221_vm0, %v590_v5, 0  ;;  %v591_v7 = vld [vmem:[%s645_s15 + $0x18] sm:$0xff]   ;;  %v593_v10 = vld [vmem:[%s645_s15 + $0x28] sm:$0xff]   ;;  %s163_s23 = scalar_lea.vmem %s708_s2, %s480_s20 }
  0x12   : > { %517 = vmatpush3.bf16.xpose.msra.mxu0 %v223_v2  ;;  %556 = vmatpush3.bf16.xpose.msra.mxu1 %v223_v2  ;;  %v232_v8 = vsel %vm221_vm0, %v591_v7, 0  ;;  %v235_v9 = vsel %vm221_vm0, %v592_v3, 0  ;;  %v238_v11 = vsel %vm221_vm0, %v593_v10, 0  ;;  %v594_v12 = vld [vmem:[%s645_s15 + $0x30] sm:$0xff]   ;;  %v595_v14 = vld [vmem:[%s645_s15 + $0x38] sm:$0xff]   ;;  %v379_v58 = vld [vmem:[%s159_s19] sm:$0xff] }
  0x13   : > { %566 = vmatprep.subr.msk.bf16.mxu0 %vm221_vm0, %v589_v1  ;;  %567 = vmatprep.subr.msk.bf16.mxu1 %vm221_vm0, %v589_v1  ;;  %v241_v13 = vsel %vm221_vm0, %v594_v12, 0  ;;  %v244_v15 = vsel %vm221_vm0, %v595_v14, 0  ;;  %v380_v59 = vld [vmem:[%s159_s19 + $0x8] sm:$0xff]  ;;  %vm381_vm7 = vcmp.gt.f32.partialorder %v379_v58, 0.5 }
  0x14   : > { %532 = vmatprep.mubr.msk.bf16.mxu0 %vm221_vm0, %v588_v0  ;;  %540 = vmatprep.mubr.msk.bf16.mxu1 %vm221_vm0, %v592_v3  ;;  %vm382_vm8 = vcmp.gt.f32.partialorder %v380_v59, 0.5 }
  0x1a   : > { %519 = vmatpush3.bf16.xpose.msra.mxu0 %v226_v4  ;;  %557 = vmatpush3.bf16.xpose.msra.mxu1 %v226_v4 }
  0x1b   : > { %568 = vmatprep.subr.msk.bf16.mxu0 %vm221_vm0, %v590_v5  ;;  %569 = vmatprep.subr.msk.bf16.mxu1 %vm221_vm0, %v590_v5 }
  0x22   : > { %521 = vmatpush3.bf16.xpose.msra.mxu0 %v229_v6  ;;  %558 = vmatpush3.bf16.xpose.msra.mxu1 %v229_v6 }
  0x23   : > { %570 = vmatprep.subr.msk.bf16.mxu0 %vm221_vm0, %v591_v7  ;;  %571 = vmatprep.subr.msk.bf16.mxu1 %vm221_vm0, %v591_v7 }
  0x2a   : > { %523 = vmatpush3.bf16.xpose.msra.mxu0 %v232_v8  ;;  %559 = vmatpush3.bf16.xpose.msra.mxu1 %v232_v8 }
  0x2b   : > { %572 = vmatprep.subr.msk.bf16.mxu0 %vm221_vm0, %v592_v3  ;;  %573 = vmatprep.subr.msk.bf16.mxu1 %vm221_vm0, %v592_v3 }
  0x32   : > { %525 = vmatpush3.bf16.xpose.msra.mxu0 %v235_v9  ;;  %560 = vmatpush3.bf16.xpose.msra.mxu1 %v235_v9 }
  0x33   : > { %574 = vmatprep.subr.msk.bf16.mxu0 %vm221_vm0, %v593_v10  ;;  %575 = vmatprep.subr.msk.bf16.mxu1 %vm221_vm0, %v593_v10 }
  0x3a   : > { %527 = vmatpush3.bf16.xpose.msra.mxu0 %v238_v11  ;;  %561 = vmatpush3.bf16.xpose.msra.mxu1 %v238_v11 }
  0x3b   : > { %576 = vmatprep.subr.msk.bf16.mxu0 %vm221_vm0, %v594_v12  ;;  %577 = vmatprep.subr.msk.bf16.mxu1 %vm221_vm0, %v594_v12 }
  0x42   : > { %529 = vmatpush3.bf16.xpose.msra.mxu0 %v241_v13  ;;  %562 = vmatpush3.bf16.xpose.msra.mxu1 %v241_v13 }
  0x43   : > { %578 = vmatprep.subr.msk.bf16.mxu0 %vm221_vm0, %v595_v14  ;;  %579 = vmatprep.subr.msk.bf16.mxu1 %vm221_vm0, %v595_v14 }
  0x4a   : > { %531 = vmatpush3.bf16.xpose.msra.mxu0 %v244_v15  ;;  %563 = vmatpush3.bf16.xpose.msra.mxu1 %v244_v15 }
  0x51   : > { %533 = vmatmul.mubr.msk.bf16.vlgmr.msra.gmra.mrb[0].mxu0 %vm221_vm0, %v589_v1  ;;  %541 = vmatmul.mubr.msk.bf16.vlgmr.msra.gmra.mrb[0].mxu1 %vm221_vm0, %v593_v10 }
  0x52   : > { %536 = vmatprep.mubr.msk.bf16.mxu0 %vm221_vm0, %v590_v5  ;;  %544 = vmatprep.mubr.msk.bf16.mxu1 %vm221_vm0, %v594_v12 }
  0x59   : > { %537 = vmatmul.mubr.msk.bf16.gmra.mrb[4].mxu0 %vm221_vm0, %v591_v7  ;;  %545 = vmatmul.mubr.msk.bf16.gmra.mrb[4].mxu1 %vm221_vm0, %v595_v14 }
 0x124   : > { %v534_v16 = vpop.f32.mrb[0].mxu0  ;;  %v542_v17 = vpop.f32.mrb[0].mxu1 }
 0x125   : > { %v280_v18 = vpop.f32.mrb[1].mxu0  ;;  %v312_v19 = vpop.f32.mrb[1].mxu1 }
 0x126   : > { %v344_v20 = vsel %vm343_vm1, %v280_v18, %v534_v16  ;;  %v535_v21 = vpop.f32.mrb[2].mxu0  ;;  %v543_v22 = vpop.f32.mrb[2].mxu1 }
 0x127   : > { %v283_v23 = vpop.f32.mrb[3].mxu0  ;;  %v315_v24 = vpop.f32.mrb[3].mxu1 }
 0x128   : > { %v345_v25 = vsel %vm343_vm1, %v283_v23, %v535_v21 }
 0x12c   : > { %v538_v26 = vpop.f32.mrb[4].mxu0  ;;  %v546_v27 = vpop.f32.mrb[4].mxu1 }
 0x12d   : > { %v296_v28 = vpop.f32.mrb[5].mxu0  ;;  %v328_v29 = vpop.f32.mrb[5].mxu1 }
 0x12e   : > { %v346_v30 = vsel %vm221_vm0, %v344_v20, %v296_v28  ;;  %v539_v31 = vpop.f32.mrb[6].mxu0  ;;  %v547_v32 = vpop.f32.mrb[6].mxu1 }
 0x12f   : > { %v349_v33 = vsel %vm348_vm2, %v346_v30, %v538_v26  ;;  %v299_v34 = vpop.f32.mrb[7].mxu0  ;;  %v331_v35 = vpop.f32.mrb[7].mxu1 }
 0x130   : > { %v352_v36 = vsel %vm351_vm3, %v349_v33, %v312_v19  ;;  %v347_v37 = vsel %vm221_vm0, %v345_v25, %v299_v34 }
 0x131   : > { %v355_v38 = vsel %vm354_vm4, %v352_v36, %v542_v17  ;;  %v350_v39 = vsel %vm348_vm2, %v347_v37, %v539_v31 }
 0x132   : > { %v358_v40 = vsel %vm357_vm5, %v355_v38, %v328_v29  ;;  %v353_v41 = vsel %vm351_vm3, %v350_v39, %v315_v24 }
 0x133   : > { %v361_v42 = vsel %vm360_vm6, %v358_v40, %v546_v27  ;;  %v356_v43 = vsel %vm354_vm4, %v353_v41, %v543_v22 }
 0x134   : > { %v363_v44 = vmul.f32 0.5, %v361_v42  ;;  %v359_v45 = vsel %vm357_vm5, %v356_v43, %v331_v35 }
 0x135   : > { %v362_v46 = vsel %vm360_vm6, %v359_v45, %v547_v32 }
 0x136   : > { %596 = vtanh.f32 %v363_v44  ;;  %v364_v47 = vmul.f32 0.5, %v362_v46 }
 0x138   : > { %598 = vtanh.f32 %v364_v47 }
 0x140   : > { %v597_v48 = vpop.eup %596 }
 0x141   : > { %v367_v49 = vsub.f32 0.0, %v597_v48 }
 0x142   : > { %v599_v50 = vpop.eup %598 }
 0x143   : > { %v369_v51 = vmul.f32 1.442695, %v367_v49  ;;  %v368_v52 = vsub.f32 0.0, %v599_v50 }
 0x145   : > { %600 = vpow2.f32 %v369_v51  ;;  %v371_v53 = vmul.f32 1.442695, %v368_v52 }
 0x147   : > { %602 = vpow2.f32 %v371_v53 }
 0x14f   : > { %v601_v54 = vpop.eup %600 }
 0x150   : > { %v373_v55 = vadd.f32 1.0, %v601_v54 }
 0x151   : > { %v603_v56 = vpop.eup %602 }
 0x152   : > { %604 = vlog2.f32 %v373_v55  ;;  %v374_v57 = vadd.f32 1.0, %v603_v56 }
 0x154   : > { %606 = vlog2.f32 %v374_v57 }
 0x15c   : > { %v605_v60 = vpop.eup %604 }
 0x15d   : > { %v376_v61 = vmul.f32 0.6931472, %v605_v60 }
 0x15e   : > { %v607_v62 = vpop.eup %606 }
 0x15f   : > { %v385_v63 = vsub.f32 %v376_v61, %v367_v49  ;;  %v378_v0 = vmul.f32 0.6931472, %v607_v62  ;;  %v383_v1 = vsel %vm381_vm7, %v376_v61, 0.0 }
 0x161   : > { %v384_v2 = vsel %vm382_vm8, %v378_v0, 0.0  ;;  %v386_v3 = vsub.f32 %v378_v0, %v368_v52  ;;  %v387_v5 = vsel %vm381_vm7, 0.0, %v385_v63 }
 0x162   : > { %v389_v4 = vadd.f32 %v384_v2, %v383_v1 }
 0x163   : > { %v388_v6 = vsel %vm382_vm8, 0.0, %v386_v3 }
 0x164   : > { %v390_v7 = vrot.slane %v389_v4, 4  ;;  %v396_v8 = vadd.f32 %v388_v6, %v387_v5 }
 0x166   : > { %v391_v9 = vadd.f32 %v390_v7, %v389_v4  ;;  %v397_v10 = vrot.slane %v396_v8, 4 }
 0x168   : > { %v392_v11 = vrot.slane %v391_v9, 2  ;;  %v398_v12 = vadd.f32 %v397_v10, %v396_v8 }
 0x16a   : > { %v393_v13 = vadd.f32 %v392_v11, %v391_v9  ;;  %v399_v14 = vrot.slane %v398_v12, 2 }
 0x16c   : > { %v394_v15 = vrot.slane %v393_v13, 1  ;;  %v400_v16 = vadd.f32 %v399_v14, %v398_v12 }
 0x16e   : > { %v401_v17 = vrot.slane %v400_v16, 1  ;;  %v395_v18 = vadd.f32 %v394_v15, %v393_v13 }
 0x170   : > { %v402_v19 = vadd.f32 %v401_v17, %v400_v16 }
 0x172   : > { %v404_v20 = vsel %vm403_vm9, %v395_v18, %v402_v19 }
 0x173   : > { %405 = vst [vmem:[%s163_s23] sm:$0x3] %v404_v20 }
 0x174 PF: > { %s12_s9 = sadd.s32 1, %s614_s9  }
 0x175   : > { %p9_p5 = scmp.ge.s32.totalorder %s12_s9, 4  }
 0x177   :  { %11 = sbr.rel (!%p9_p5) target bundleno = 1 (0x1), region = 61 }

</bundles_post_ra>
